<compile_context>
chip_gen: v7x
topology: tpu7x:2x2x1
jax: 0.10.0
libtpu: 0.0.40
codegen_flags: <defaults>
</compile_context>

<pallas_src>
import jax
import jax.numpy as jnp
from jax.experimental import pallas as pl
from jax.experimental.pallas import tpu as pltpu

LANES = 128      # vreg lane width
SUBLANES = 8     # f32 vreg sublane count


def _round_up(n, m):
    return ((n + m - 1) // m) * m


def linear1_kernel(w_ref, b_ref, x_ref, o_ref):
    """o[c, r, l] = x[r, l] * w[c] + b[c]  (rank-1 'matmul' on the VPU).

    w_ref, b_ref : SMEM f32[C]          per-class scalar weight / bias
    x_ref        : VMEM f32[TR, 128]    lane-dense batch slab
    o_ref        : VMEM f32[C, TR, 128] lane-dense output slab
    """
    x = x_ref[...]                          # one dense tile load, reused C times
    for c in range(o_ref.shape[0]):         # static unroll (C is small)
        o_ref[c] = x * w_ref[c] + b_ref[c]  # VPU broadcast FMA, unmasked dense vst


def logistic_regression_forward(x, weight, bias, *, max_block_rows=512):
    """x: (B, 1), weight: (C, 1), bias: (C,)  ->  (B, C) float32."""
    B = x.shape[0]
    C = weight.shape[0]

    # ---- layout plumbing (plain JAX glue, fused by XLA) --------------------
    R = pl.cdiv(B, LANES)                 # lane-dense rows needed for the batch
    Rp = _round_up(R, SUBLANES)           # sublane alignment
    TR = min(max_block_rows, Rp)          # rows per grid step (tile)
    Rp = _round_up(Rp, TR)                # pad rows to a whole number of tiles

    xf = x.reshape(B).astype(jnp.float32)
    x_slab = jnp.pad(xf, (0, Rp * LANES - B)).reshape(Rp, LANES)  # lane-dense slab

    w_flat = weight.reshape(C).astype(jnp.float32)
    b_flat = bias.reshape(C).astype(jnp.float32)

    grid = (Rp // TR,)

    cost = pl.CostEstimate(
        flops=2 * B * C,
        transcendentals=0,
        bytes_accessed=4 * (B + 2 * C + B * C),
    )

    out3 = pl.pallas_call(
        linear1_kernel,
        out_shape=jax.ShapeDtypeStruct((C, Rp, LANES), jnp.float32),
        grid=grid,
        in_specs=[
            pl.BlockSpec(memory_space=pltpu.MemorySpace.SMEM),   # weight scalars
            pl.BlockSpec(memory_space=pltpu.MemorySpace.SMEM),   # bias scalars
            pl.BlockSpec((TR, LANES), lambda i: (i, 0)),         # lane-dense x tile
        ],
        out_specs=pl.BlockSpec((C, TR, LANES), lambda i: (0, i, 0)),
        compiler_params=pltpu.CompilerParams(
            # batch tiles are independent -> shard across v7x's two TensorCores
            dimension_semantics=("parallel",),
        ),
        cost_estimate=cost,
    )(w_flat, b_flat, x_slab)

    # (C, Rp, 128) -> (B, C): drop the batch padding, back to nn.Linear layout.
    return out3.reshape(C, Rp * LANES)[:, :B].T


if __name__ == "__main__":
    num_classes = 4
    key = jax.random.PRNGKey(0)
    kx, kw, kb = jax.random.split(key, 3)

    # nn.Linear(1, num_classes) parameters.
    weight = jax.random.normal(kw, (num_classes, 1), dtype=jnp.float32) * 0.5
    bias = jax.random.normal(kb, (num_classes,), dtype=jnp.float32) * 0.1

    # Case 1: toy batch matching the module's intended use (single scalar feature).
    x_small = jax.random.normal(kx, (8, 1), dtype=jnp.float32)
    out_small = jax.block_until_ready(
        logistic_regression_forward(x_small, weight, bias))
    ref_small = x_small @ weight.T + bias
    assert out_small.shape == (8, num_classes)
    assert jnp.allclose(out_small, ref_small, atol=1e-5, rtol=1e-5)

    # Case 2: larger batch that actually exercises the lane-dense batch tiling.
    x_big = jax.random.normal(kx, (2048, 1), dtype=jnp.float32)
    out_big = jax.block_until_ready(
        logistic_regression_forward(x_big, weight, bias))
    ref_big = x_big @ weight.T + bias
    assert out_big.shape == (2048, num_classes)
    assert jnp.allclose(out_big, ref_big, atol=1e-5, rtol=1e-5)

    print("KERNEL_OK")
</pallas_src>

<mosaic_0001>
module attributes {stable_mosaic.version = 11 : i64} {
  func.func @linear1_kernel(%arg0: i32, %arg1: memref<4xf32, #tpu.memory_space<smem>>, %arg2: memref<4xf32, #tpu.memory_space<smem>>, %arg3: memref<8x128xf32, #tpu.memory_space<vmem>>, %arg4: memref<4x8x128xf32, #tpu.memory_space<vmem>>) attributes {dimension_semantics = [#tpu.dimension_semantics<parallel>], iteration_bounds = array<i64: 1>, scalar_prefetch = 0 : i64, scratch_operands = 0 : i64, tpu.core_type = #tpu.core_type<tc>, window_params = [{transform_indices = @transform_0, window_bounds = array<i64: 4>}, {transform_indices = @transform_1, window_bounds = array<i64: 4>}, {transform_indices = @transform_2, window_bounds = array<i64: 8, 128>}, {transform_indices = @transform_3, window_bounds = array<i64: 4, 8, 128>}]} {
    %c0 = arith.constant 0 : index
    %c0_0 = arith.constant 0 : index
    %0 = vector.load %arg3[%c0, %c0_0] : memref<8x128xf32, #tpu.memory_space<vmem>>, vector<8x128xf32>
    %c0_1 = arith.constant 0 : index
    %1 = memref.load %arg1[%c0_1] : memref<4xf32, #tpu.memory_space<smem>>
    %2 = vector.broadcast %1 : f32 to vector<8x128xf32>
    %3 = arith.mulf %0, %2 : vector<8x128xf32>
    %c0_2 = arith.constant 0 : index
    %4 = memref.load %arg2[%c0_2] : memref<4xf32, #tpu.memory_space<smem>>
    %5 = vector.broadcast %4 : f32 to vector<8x128xf32>
    %6 = arith.addf %3, %5 : vector<8x128xf32>
    %c0_3 = arith.constant 0 : index
    %c0_4 = arith.constant 0 : index
    %c0_5 = arith.constant 0 : index
    %7 = vector.load %arg4[%c0_3, %c0_4, %c0_5] : memref<4x8x128xf32, #tpu.memory_space<vmem>>, vector<1x8x128xf32>
    %8 = vector.shape_cast %7 : vector<1x8x128xf32> to vector<8x128xf32>
    %9 = vector.shape_cast %6 : vector<8x128xf32> to vector<1x8x128xf32>
    tpu.vector_store %arg4[%c0_3, %c0_4, %c0_5], %9 {strides = array<i32>} : memref<4x8x128xf32, #tpu.memory_space<vmem>>, vector<1x8x128xf32>,
    %c1 = arith.constant 1 : index
    %10 = memref.load %arg1[%c1] : memref<4xf32, #tpu.memory_space<smem>>
    %11 = vector.broadcast %10 : f32 to vector<8x128xf32>
    %12 = arith.mulf %0, %11 : vector<8x128xf32>
    %c1_6 = arith.constant 1 : index
    %13 = memref.load %arg2[%c1_6] : memref<4xf32, #tpu.memory_space<smem>>
    %14 = vector.broadcast %13 : f32 to vector<8x128xf32>
    %15 = arith.addf %12, %14 : vector<8x128xf32>
    %c1_7 = arith.constant 1 : index
    %c0_8 = arith.constant 0 : index
    %c0_9 = arith.constant 0 : index
    %16 = vector.load %arg4[%c1_7, %c0_8, %c0_9] : memref<4x8x128xf32, #tpu.memory_space<vmem>>, vector<1x8x128xf32>
    %17 = vector.shape_cast %16 : vector<1x8x128xf32> to vector<8x128xf32>
    %18 = vector.shape_cast %15 : vector<8x128xf32> to vector<1x8x128xf32>
    tpu.vector_store %arg4[%c1_7, %c0_8, %c0_9], %18 {strides = array<i32>} : memref<4x8x128xf32, #tpu.memory_space<vmem>>, vector<1x8x128xf32>,
    %c2 = arith.constant 2 : index
    %19 = memref.load %arg1[%c2] : memref<4xf32, #tpu.memory_space<smem>>
    %20 = vector.broadcast %19 : f32 to vector<8x128xf32>
    %21 = arith.mulf %0, %20 : vector<8x128xf32>
    %c2_10 = arith.constant 2 : index
    %22 = memref.load %arg2[%c2_10] : memref<4xf32, #tpu.memory_space<smem>>
    %23 = vector.broadcast %22 : f32 to vector<8x128xf32>
    %24 = arith.addf %21, %23 : vector<8x128xf32>
    %c2_11 = arith.constant 2 : index
    %c0_12 = arith.constant 0 : index
    %c0_13 = arith.constant 0 : index
    %25 = vector.load %arg4[%c2_11, %c0_12, %c0_13] : memref<4x8x128xf32, #tpu.memory_space<vmem>>, vector<1x8x128xf32>
    %26 = vector.shape_cast %25 : vector<1x8x128xf32> to vector<8x128xf32>
    %27 = vector.shape_cast %24 : vector<8x128xf32> to vector<1x8x128xf32>
    tpu.vector_store %arg4[%c2_11, %c0_12, %c0_13], %27 {strides = array<i32>} : memref<4x8x128xf32, #tpu.memory_space<vmem>>, vector<1x8x128xf32>,
    %c3 = arith.constant 3 : index
    %28 = memref.load %arg1[%c3] : memref<4xf32, #tpu.memory_space<smem>>
    %29 = vector.broadcast %28 : f32 to vector<8x128xf32>
    %30 = arith.mulf %0, %29 : vector<8x128xf32>
    %c3_14 = arith.constant 3 : index
    %31 = memref.load %arg2[%c3_14] : memref<4xf32, #tpu.memory_space<smem>>
    %32 = vector.broadcast %31 : f32 to vector<8x128xf32>
    %33 = arith.addf %30, %32 : vector<8x128xf32>
    %c3_15 = arith.constant 3 : index
    %c0_16 = arith.constant 0 : index
    %c0_17 = arith.constant 0 : index
    %34 = vector.load %arg4[%c3_15, %c0_16, %c0_17] : memref<4x8x128xf32, #tpu.memory_space<vmem>>, vector<1x8x128xf32>
    %35 = vector.shape_cast %34 : vector<1x8x128xf32> to vector<8x128xf32>
    %36 = vector.shape_cast %33 : vector<8x128xf32> to vector<1x8x128xf32>
    tpu.vector_store %arg4[%c3_15, %c0_16, %c0_17], %36 {strides = array<i32>} : memref<4x8x128xf32, #tpu.memory_space<vmem>>, vector<1x8x128xf32>,
    return
  }
  func.func @transform_0(%arg0: i32) -> i32 {
    %c0_i32 = arith.constant 0 : i32
    %c0_i32_0 = arith.constant 0 : i32
    return %c0_i32 : i32
  }
  func.func @transform_1(%arg0: i32) -> i32 {
    %c0_i32 = arith.constant 0 : i32
    %c0_i32_0 = arith.constant 0 : i32
    return %c0_i32 : i32
  }
  func.func @transform_2(%arg0: i32) -> (i32, i32) {
    %c0_i32 = arith.constant 0 : i32
    %c0_i32_0 = arith.constant 0 : i32
    return %arg0, %c0_i32 : i32, i32
  }
  func.func @transform_3(%arg0: i32) -> (i32, i32, i32) {
    %c0_i32 = arith.constant 0 : i32
    %c0_i32_0 = arith.constant 0 : i32
    %c0_i32_1 = arith.constant 0 : i32
    return %c0_i32, %arg0, %c0_i32_0 : i32, i32, i32
  }
}

</mosaic_0001>

<bundles_post_ra>
// kernel: tpu_custom_call.1
= control target key start
LH: loop header
LB: loop body
LE: loop exit
PB: predicated region body
PF: predicated region fallthrough
CT: control target
= control target key end

     0   :  { %8 = vsyncpa [#allocation5], 0  ;;  %s252_s0 = inlined_call_operand.hbm [shape: f32[4], index: 0, kind: input, shape index: {}]   ;;  %s253_s1 = inlined_call_operand.vmem [shape: f32[4], index: 1, kind: input, shape index: {}]   ;;  %s254_s2 = inlined_call_operand.hbm [shape: f32[8,128], index: 2, kind: input, shape index: {}]   ;;  %s255_s3 = inlined_call_operand.hbm [shape: f32[4,8,128], index: 3, kind: output, shape index: {}]  }
   0x1   :  { %9 = vsyncpa [#allocation6], 0 }
   0x2   :  { %10 = vsyncpa [#allocation3], 0 }
   0x3   :  { %11 = vsyncpa [#allocation4], 0  ;;  %s26_s14 = sshll.u32 %s253_s1, 4  ;;  %s113_s17 = scalar_lea.hbm %s252_s0, 16  ;;  %s27_s14 = int_to_ptr.vmem [resolvable:$true] %s26_s14 }
   0x4   :  { %p114_p0 = scmp.ne.s32.totalorder %s252_s0, %s113_s17  ;;  %p117_p1 = scmp.lt.u32.totalorder %s113_s17, %s252_s0 }
   0x6   :  { %p119_p2 = pnand %p117_p1, %p114_p0 }
   0x8   :  { %122 = shalt.err (!%p119_p2)
}
   0x9   :  { %s187_s22 = smov [#allocation2]   ;;  %s123_s1 = scalar_lea.vmem %s27_s14, 16 }
   0xa   :  { %19 = dma.hbm_to_smem %s252_s0, 16, %s187_s22, [#allocation5]  }
   0xb   :  { %p124_p3 = scmp.ne.s32.totalorder %s27_s14, %s123_s1  ;;  %p128_p4 = scmp.lt.s32.totalorder %s27_s14, %s27_s14 }
   0xc   :  { %p129_p5 = scmp.lt.s32.totalorder %s123_s1, %s123_s1 }
   0xe   :  { %p130_p6 = por %p129_p5, %p128_p4 }
  0x10   :  { %p131_p7 = pnand %p130_p6, %p124_p3 }
  0x12   :  { %134 = shalt.err (!%p131_p7)
}
  0x13   :  { %s188_s25 = smov [#allocation7]   ;;  %s189_s26 = smov [#allocation8]  }
  0x14   :  { %29 = dma.vmem_to_smem %s27_s14, 16, %s188_s25, [#allocation6]  }
  0x15   :  { %s36_s27 = sshll.u32 %s189_s26, 4  ;;  %s135_s30 = scalar_lea.hbm %s254_s2, 128  ;;  %s37_s27 = int_to_ptr.vmem [resolvable:$true] %s36_s27 }
  0x16   :  { %p136_p8 = scmp.ne.s32.totalorder %s254_s2, %s135_s30  ;;  %p139_p9 = scmp.lt.u32.totalorder %s135_s30, %s254_s2 }
  0x18   :  { %p141_p10 = pnand %p139_p9, %p136_p8 }
  0x1a   :  { %144 = shalt.err (!%p141_p10)
}
  0x1b   :  { %s145_s7 = scalar_lea.vmem %s37_s27, 128  ;;  %p150_p12 = scmp.lt.s32.totalorder %s37_s27, %s37_s27 }
  0x1c   :  { %p146_p11 = scmp.ne.s32.totalorder %s37_s27, %s145_s7  ;;  %p151_p13 = scmp.lt.s32.totalorder %s145_s7, %s145_s7 }
  0x1e   :  { %p152_p0 = por %p151_p13, %p150_p12 }
  0x20   :  { %p153_p1 = pnand %p152_p0, %p146_p11 }
  0x22   :  { %156 = shalt.err (!%p153_p1)
}
  0x23   :  { %39 = dma.hbm_to_vmem [thread:$0]  %s254_s2, 128, %s37_s27, [#allocation3]  }
  0x24   :  { %179 = dma.done.wait [#allocation5], 16  }
  0x25   :  { %180 = vsyncadd [#allocation5], 4294967280 }
  0x26   :  { %181 = dma.done.wait [#allocation6], 16  }
  0x27   :  { %182 = vsyncadd [#allocation6], 4294967280 }
  0x28   :  { %183 = dma.done.wait [#allocation3], 128  }
  0x29   :  { %184 = vsyncadd [#allocation3], 4294967168 }
  0x2a   :  { %49 = sfence }
  0x2b   :  { %s51_s10 = sld [smem:[#allocation2]]  ;;  %s101_s12 = sld [smem:[#allocation2 + $0x1]]  ;;  %v50_v0 = vld [vmem:[#allocation8] sm:$0xff] }
  0x2c   :  { %s54_s11 = sld [smem:[#allocation7]]  ;;  %s102_s13 = sld [smem:[#allocation7 + $0x1]] }
  0x2d   :  { %s103_s14 = sld [smem:[#allocation2 + $0x2]]  ;;  %s105_s16 = sld [smem:[#allocation2 + $0x3]] }
  0x2e   :  { %s104_s15 = sld [smem:[#allocation7 + $0x2]]  ;;  %s106_s17 = sld [smem:[#allocation7 + $0x3]] }
  0x2f   :  { %s190_s2 = smov [#allocation9]  }
  0x30   :  { %s87_s18 = sshll.u32 %s190_s2, 4  ;;  %s88_s18 = int_to_ptr.vmem [resolvable:$true] %s87_s18 }
  0x31   :  { %v52_v1 = vstv %s51_s10  ;;  %v59_v4 = vstv %s101_s12  ;;  %s157_s19 = scalar_lea.vmem %s88_s18, 512  ;;  %p162_p3 = scmp.lt.s32.totalorder %s88_s18, %s88_s18 }
  0x32   :  { %v55_v2 = vstv %s54_s11  ;;  %v53_v3 = vmul.f32 %v52_v1, %v50_v0  ;;  %v62_v5 = vstv %s102_s13  ;;  %v60_v6 = vmul.f32 %v59_v4, %v50_v0  ;;  %p158_p2 = scmp.ne.s32.totalorder %s88_s18, %s157_s19  ;;  %p163_p4 = scmp.lt.s32.totalorder %s157_s19, %s157_s19 }
  0x33   :  { %v67_v7 = vstv %s103_s14  ;;  %v75_v11 = vstv %s105_s16 }
  0x34   :  { %v70_v8 = vstv %s104_s15  ;;  %v56_v9 = vadd.f32 %v55_v2, %v53_v3  ;;  %v68_v10 = vmul.f32 %v67_v7, %v50_v0  ;;  %v78_v12 = vstv %s106_s17  ;;  %p164_p5 = por %p163_p4, %p162_p3 }
  0x35   :  { %v63_v13 = vadd.f32 %v62_v5, %v60_v6  ;;  %v76_v14 = vmul.f32 %v75_v11, %v50_v0 }
  0x36   :  { %57 = vst [vmem:[#allocation9] sm:$0xff] %v56_v9  ;;  %v71_v15 = vadd.f32 %v70_v8, %v68_v10  ;;  %p165_p6 = pnand %p164_p5, %p158_p2 }
  0x37   :  { %65 = vst [vmem:[#allocation9 + $0x8] sm:$0xff] %v63_v13  ;;  %v79_v16 = vadd.f32 %v78_v12, %v76_v14 }
  0x38   :  { %73 = vst [vmem:[#allocation9 + $0x10] sm:$0xff] %v71_v15 }
  0x39   :  { %81 = vst [vmem:[#allocation9 + $0x18] sm:$0xff] %v79_v16 }
  0x3a   :  { %168 = shalt.err (!%p165_p6)
}
  0x3b   :  { %s169_s22 = scalar_lea.hbm %s255_s3, 512 }
  0x3c   :  { %p170_p7 = scmp.ne.s32.totalorder %s255_s3, %s169_s22  ;;  %p173_p8 = scmp.lt.u32.totalorder %s169_s22, %s255_s3 }
  0x3e   :  { %p175_p9 = pnand %p173_p8, %p170_p7 }
  0x40   :  { %178 = shalt.err (!%p175_p9)
}
  0x41   :  { %s191_s26 = smov 128   ;;  %s192_s27 = smov 8  }
  0x42   :  { %93 = dma.vmem_to_hbm [thread:$0]  %s88_s18, 512, %s255_s3, [#allocation4], %s191_s26, %s191_s26, %s192_s27  }
  0x43   :  { %185 = dma.done.wait [#allocation4], 512  }
  0x44   :  { %186 = vsyncadd [#allocation4], 4294966784 }
  0x45   :  { %97 = vsyncpa [#allocation3], 1 }
  0x46   :  { %98 = vsyncpa [#allocation4], 1 }
  0x47   :  { %99 = vsyncpa [#allocation5], 1 }
  0x48   :  { %100 = vsyncpa [#allocation6], 1 }

</bundles_post_ra>
